<compile_context>
chip_gen: v6e
topology: v6e:2x2x1
jax: 0.10.0
libtpu: 0.0.40
codegen_flags: <defaults>
</compile_context>

<pallas_src>
import functools

import jax
import jax.numpy as jnp
from jax.experimental import pallas as pl
from jax.experimental.pallas import tpu as pltpu


def _elu(v):
    # ELU(alpha=1): x if x > 0 else exp(x) - 1   (matches torch.nn.ELU)
    return jnp.where(v > 0, v, jnp.exp(v) - 1.0)


def _round_up(x, m):
    return ((x + m - 1) // m) * m


def _inverse_model_kernel(m_valid,
                          xp_ref, xn_ref,
                          w1a_ref, w1b_ref, b1_ref,
                          w2_ref, b2_ref,
                          w3_ref, b3_ref,
                          out_ref):
    # first Linear: cat([xp, xn], -1) @ W1.T  ==  xp @ W1a + xn @ W1b
    h = jnp.dot(xp_ref[...], w1a_ref[...], preferred_element_type=jnp.float32)
    h = h + jnp.dot(xn_ref[...], w1b_ref[...], preferred_element_type=jnp.float32)
    h = _elu(h + b1_ref[...])
    h = _elu(jnp.dot(h, w2_ref[...], preferred_element_type=jnp.float32) + b2_ref[...])
    y = jnp.dot(h, w3_ref[...], preferred_element_type=jnp.float32) + b3_ref[...]

    # rows >= m_valid are the off-by-one tail (and alignment padding): fill -1
    tb = out_ref.shape[0]
    row = pl.program_id(0) * tb + jax.lax.broadcasted_iota(jnp.int32, y.shape, 0)
    out_ref[...] = jnp.where(row < m_valid, y, -1.0)


def inverse_model(obs, params, tb=256):
    """obs: (T, B, h_dim) float32. Returns (T, B, action_space) float32."""
    w1, b1, w2, b2, w3, b3 = params
    T, B, D = obs.shape
    H = w1.shape[0]                    # 128
    A = w3.shape[0]                    # action_space
    assert w1.shape == (H, 2 * D)

    m_valid = (T - 1) * B              # rows with real predictions
    m_total = T * B                    # rows incl. the off-by-one -1 row(s)
    tb = min(tb, _round_up(m_total, 8))
    m_pad = _round_up(m_total, tb)

    # --- glue: time-shifted views of obs, flattened to rows, padded to the grid ---
    obs = obs.astype(jnp.float32)
    xp = obs[:-1].reshape(m_valid, D)
    xn = obs[1:].reshape(m_valid, D)
    pad = m_pad - m_valid
    xp = jnp.pad(xp, ((0, pad), (0, 0)))
    xn = jnp.pad(xn, ((0, pad), (0, 0)))

    # --- glue: re-layout PyTorch Linear weights for row-major (M,K)@(K,N) matmuls ---
    w1a = w1[:, :D].T                  # (D, H)  obs[:-1] half of W1
    w1b = w1[:, D:].T                  # (D, H)  obs[1:]  half of W1
    w2t = w2.T                         # (H, H)
    w3t = w3.T                         # (H, A)
    b1r = b1.reshape(1, H)
    b2r = b2.reshape(1, H)
    b3r = b3.reshape(1, A)

    rep = lambda i: (0, 0)
    out = pl.pallas_call(
        functools.partial(_inverse_model_kernel, m_valid),
        out_shape=jax.ShapeDtypeStruct((m_pad, A), jnp.float32),
        grid_spec=pltpu.PrefetchScalarGridSpec(
            num_scalar_prefetch=0,
            grid=(m_pad // tb,),
            in_specs=[
                pl.BlockSpec((tb, D), lambda i: (i, 0)),   # xp (row-tiled)
                pl.BlockSpec((tb, D), lambda i: (i, 0)),   # xn (row-tiled)
                pl.BlockSpec((D, H), rep),                 # W1a
                pl.BlockSpec((D, H), rep),                 # W1b
                pl.BlockSpec((1, H), rep),                 # b1
                pl.BlockSpec((H, H), rep),                 # W2
                pl.BlockSpec((1, H), rep),                 # b2
                pl.BlockSpec((H, A), rep),                 # W3
                pl.BlockSpec((1, A), rep),                 # b3
            ],
            out_specs=pl.BlockSpec((tb, A), lambda i: (i, 0)),
        ),
        compiler_params=pltpu.CompilerParams(
            dimension_semantics=("parallel",)),
    )(xp, xn, w1a, w1b, b1r, w2t, b2r, w3t, b3r)

    return out[:m_total].reshape(T, B, A)


# ------------------------- deterministic parameters -------------------------
def init_params(key, h_dim, action_space):
    in_dim = 2 * h_dim
    ks = jax.random.split(key, 6)

    def u(k, shape, fan_in):
        bound = 1.0 / jnp.sqrt(float(fan_in))
        return jax.random.uniform(k, shape, jnp.float32, -bound, bound)

    w1 = u(ks[0], (128, in_dim), in_dim)          # Linear(2*h_dim, 128)
    b1 = u(ks[1], (128,), in_dim)
    w2 = u(ks[2], (128, 128), 128)                # Linear(128, 128)
    b2 = u(ks[3], (128,), 128)
    w3 = u(ks[4], (action_space, 128), 128)       # Linear(128, action_space)
    b3 = u(ks[5], (action_space,), 128)
    return (w1, b1, w2, b2, w3, b3)


# ------------------ pure-JAX reference (mirrors the PyTorch forward) ------------------
def reference(obs, params):
    w1, b1, w2, b2, w3, b3 = params
    x = jnp.concatenate([obs[:-1], obs[1:]], axis=-1)
    h = _elu(x @ w1.T + b1)
    h = _elu(h @ w2.T + b2)
    pred = h @ w3.T + b3
    off = -jnp.ones((1, obs.shape[1], w3.shape[0]), jnp.float32)
    return jnp.concatenate([pred, off], axis=0)


if __name__ == "__main__":
    key = jax.random.PRNGKey(0)
    ko, kp = jax.random.split(key)
    T, B, h_dim, action_space = 9, 8, 64, 121
    obs = jax.random.normal(ko, (T, B, h_dim), jnp.float32)
    params = init_params(kp, h_dim, action_space)

    run = jax.jit(inverse_model, static_argnames=("tb",))
    out = jax.block_until_ready(run(obs, params))

    ref = reference(obs, params)
    assert out.shape == (T, B, action_space) and out.dtype == jnp.float32
    if not jnp.allclose(out, ref, atol=2e-2, rtol=2e-2):
        raise AssertionError(
            f"mismatch vs reference, max abs err = {float(jnp.max(jnp.abs(out - ref)))}")
    print("KERNEL_OK")
</pallas_src>

<mosaic_0001>
module attributes {stable_mosaic.version = 11 : i64} {
  func.func @_inverse_model_kernel(%arg0: i32, %arg1: memref<72x64xf32, #tpu.memory_space<vmem>>, %arg2: memref<72x64xf32, #tpu.memory_space<vmem>>, %arg3: memref<64x128xf32, #tpu.memory_space<vmem>>, %arg4: memref<64x128xf32, #tpu.memory_space<vmem>>, %arg5: memref<1x128xf32, #tpu.memory_space<vmem>>, %arg6: memref<128x128xf32, #tpu.memory_space<vmem>>, %arg7: memref<1x128xf32, #tpu.memory_space<vmem>>, %arg8: memref<128x121xf32, #tpu.memory_space<vmem>>, %arg9: memref<1x121xf32, #tpu.memory_space<vmem>>, %arg10: memref<72x121xf32, #tpu.memory_space<vmem>>) attributes {dimension_semantics = [#tpu.dimension_semantics<parallel>], iteration_bounds = array<i64: 1>, scalar_prefetch = 0 : i64, scratch_operands = 0 : i64, tpu.core_type = #tpu.core_type<tc>, window_params = [{transform_indices = @transform_0, window_bounds = array<i64: 72, 64>}, {transform_indices = @transform_1, window_bounds = array<i64: 72, 64>}, {pipeline_mode = #tpu.pipeline_mode<synchronous>, transform_indices = @transform_2, window_bounds = array<i64: 64, 128>}, {pipeline_mode = #tpu.pipeline_mode<synchronous>, transform_indices = @transform_3, window_bounds = array<i64: 64, 128>}, {pipeline_mode = #tpu.pipeline_mode<synchronous>, transform_indices = @transform_4, window_bounds = array<i64: 1, 128>}, {pipeline_mode = #tpu.pipeline_mode<synchronous>, transform_indices = @transform_5, window_bounds = array<i64: 128, 128>}, {pipeline_mode = #tpu.pipeline_mode<synchronous>, transform_indices = @transform_6, window_bounds = array<i64: 1, 128>}, {pipeline_mode = #tpu.pipeline_mode<synchronous>, transform_indices = @transform_7, window_bounds = array<i64: 128, 121>}, {pipeline_mode = #tpu.pipeline_mode<synchronous>, transform_indices = @transform_8, window_bounds = array<i64: 1, 121>}, {transform_indices = @transform_9, window_bounds = array<i64: 72, 121>}]} {
    %c0 = arith.constant 0 : index
    %c0_0 = arith.constant 0 : index
    %0 = vector.load %arg1[%c0, %c0_0] : memref<72x64xf32, #tpu.memory_space<vmem>>, vector<72x64xf32>
    %c0_1 = arith.constant 0 : index
    %c0_2 = arith.constant 0 : index
    %1 = vector.load %arg3[%c0_1, %c0_2] : memref<64x128xf32, #tpu.memory_space<vmem>>, vector<64x128xf32>
    %cst = arith.constant dense<0.000000e+00> : vector<72x128xf32>
    %2 = tpu.matmul %0, %1, %cst {dimension_numbers = #tpu.dot_dimension_numbers<[1], [0], [0], [1], [0, 0, 1, 1], [], []>} : vector<72x64xf32>, vector<64x128xf32>, vector<72x128xf32> -> vector<72x128xf32>
    %c0_3 = arith.constant 0 : index
    %c0_4 = arith.constant 0 : index
    %3 = vector.load %arg2[%c0_3, %c0_4] : memref<72x64xf32, #tpu.memory_space<vmem>>, vector<72x64xf32>
    %c0_5 = arith.constant 0 : index
    %c0_6 = arith.constant 0 : index
    %4 = vector.load %arg4[%c0_5, %c0_6] : memref<64x128xf32, #tpu.memory_space<vmem>>, vector<64x128xf32>
    %cst_7 = arith.constant dense<0.000000e+00> : vector<72x128xf32>
    %5 = tpu.matmul %3, %4, %cst_7 {dimension_numbers = #tpu.dot_dimension_numbers<[1], [0], [0], [1], [0, 0, 1, 1], [], []>} : vector<72x64xf32>, vector<64x128xf32>, vector<72x128xf32> -> vector<72x128xf32>
    %6 = arith.addf %2, %5 : vector<72x128xf32>
    %c0_8 = arith.constant 0 : index
    %c0_9 = arith.constant 0 : index
    %7 = vector.load %arg5[%c0_8, %c0_9] : memref<1x128xf32, #tpu.memory_space<vmem>>, vector<1x128xf32>
    %8 = vector.broadcast %7 : vector<1x128xf32> to vector<72x128xf32>
    %9 = arith.addf %6, %8 : vector<72x128xf32>
    %cst_10 = arith.constant 0.000000e+00 : f32
    %10 = vector.broadcast %cst_10 : f32 to vector<72x128xf32>
    %11 = arith.cmpf ogt, %9, %10 : vector<72x128xf32>
    %12 = math.exp %9 : vector<72x128xf32>
    %cst_11 = arith.constant 1.000000e+00 : f32
    %13 = vector.broadcast %cst_11 : f32 to vector<72x128xf32>
    %14 = arith.subf %12, %13 : vector<72x128xf32>
    %15 = arith.select %11, %9, %14 : vector<72x128xi1>, vector<72x128xf32>
    %c0_12 = arith.constant 0 : index
    %c0_13 = arith.constant 0 : index
    %16 = vector.load %arg6[%c0_12, %c0_13] : memref<128x128xf32, #tpu.memory_space<vmem>>, vector<128x128xf32>
    %cst_14 = arith.constant dense<0.000000e+00> : vector<72x128xf32>
    %17 = tpu.matmul %15, %16, %cst_14 {dimension_numbers = #tpu.dot_dimension_numbers<[1], [0], [0], [1], [0, 0, 1, 1], [], []>} : vector<72x128xf32>, vector<128x128xf32>, vector<72x128xf32> -> vector<72x128xf32>
    %c0_15 = arith.constant 0 : index
    %c0_16 = arith.constant 0 : index
    %18 = vector.load %arg7[%c0_15, %c0_16] : memref<1x128xf32, #tpu.memory_space<vmem>>, vector<1x128xf32>
    %19 = vector.broadcast %18 : vector<1x128xf32> to vector<72x128xf32>
    %20 = arith.addf %17, %19 : vector<72x128xf32>
    %cst_17 = arith.constant 0.000000e+00 : f32
    %21 = vector.broadcast %cst_17 : f32 to vector<72x128xf32>
    %22 = arith.cmpf ogt, %20, %21 : vector<72x128xf32>
    %23 = math.exp %20 : vector<72x128xf32>
    %cst_18 = arith.constant 1.000000e+00 : f32
    %24 = vector.broadcast %cst_18 : f32 to vector<72x128xf32>
    %25 = arith.subf %23, %24 : vector<72x128xf32>
    %26 = arith.select %22, %20, %25 : vector<72x128xi1>, vector<72x128xf32>
    %c0_19 = arith.constant 0 : index
    %c0_20 = arith.constant 0 : index
    %27 = vector.load %arg8[%c0_19, %c0_20] : memref<128x121xf32, #tpu.memory_space<vmem>>, vector<128x121xf32>
    %cst_21 = arith.constant dense<0.000000e+00> : vector<72x121xf32>
    %28 = tpu.matmul %26, %27, %cst_21 {dimension_numbers = #tpu.dot_dimension_numbers<[1], [0], [0], [1], [0, 0, 1, 1], [], []>} : vector<72x128xf32>, vector<128x121xf32>, vector<72x121xf32> -> vector<72x121xf32>
    %c0_22 = arith.constant 0 : index
    %c0_23 = arith.constant 0 : index
    %29 = vector.load %arg9[%c0_22, %c0_23] : memref<1x121xf32, #tpu.memory_space<vmem>>, vector<1x121xf32>
    %30 = vector.broadcast %29 : vector<1x121xf32> to vector<72x121xf32>
    %31 = arith.addf %28, %30 : vector<72x121xf32>
    %c72_i32 = arith.constant 72 : i32
    %32 = arith.muli %arg0, %c72_i32 : i32
    %33 = tpu.iota {dimensions = array<i32: 0>} : vector<72x121xi32>
    %34 = vector.broadcast %32 : i32 to vector<72x121xi32>
    %35 = arith.addi %34, %33 : vector<72x121xi32>
    %c64_i32 = arith.constant 64 : i32
    %36 = vector.broadcast %c64_i32 : i32 to vector<72x121xi32>
    %37 = arith.cmpi slt, %35, %36 : vector<72x121xi32>
    %cst_24 = arith.constant -1.000000e+00 : f32
    %38 = vector.broadcast %cst_24 : f32 to vector<72x121xf32>
    %39 = arith.select %37, %31, %38 : vector<72x121xi1>, vector<72x121xf32>
    %c0_25 = arith.constant 0 : index
    %c0_26 = arith.constant 0 : index
    %40 = vector.load %arg10[%c0_25, %c0_26] : memref<72x121xf32, #tpu.memory_space<vmem>>, vector<72x121xf32>
    tpu.vector_store %arg10[%c0_25, %c0_26], %39 {strides = array<i32>} : memref<72x121xf32, #tpu.memory_space<vmem>>, vector<72x121xf32>,
    return
  }
  func.func @transform_0(%arg0: i32) -> (i32, i32) {
    %c0_i32 = arith.constant 0 : i32
    %c0_i32_0 = arith.constant 0 : i32
    return %arg0, %c0_i32 : i32, i32
  }
  func.func @transform_1(%arg0: i32) -> (i32, i32) {
    %c0_i32 = arith.constant 0 : i32
    %c0_i32_0 = arith.constant 0 : i32
    return %arg0, %c0_i32 : i32, i32
  }
  func.func @transform_2(%arg0: i32) -> (i32, i32) {
    %c0_i32 = arith.constant 0 : i32
    %c0_i32_0 = arith.constant 0 : i32
    %c0_i32_1 = arith.constant 0 : i32
    return %c0_i32, %c0_i32_0 : i32, i32
  }
  func.func @transform_3(%arg0: i32) -> (i32, i32) {
    %c0_i32 = arith.constant 0 : i32
    %c0_i32_0 = arith.constant 0 : i32
    %c0_i32_1 = arith.constant 0 : i32
    return %c0_i32, %c0_i32_0 : i32, i32
  }
  func.func @transform_4(%arg0: i32) -> (i32, i32) {
    %c0_i32 = arith.constant 0 : i32
    %c0_i32_0 = arith.constant 0 : i32
    %c0_i32_1 = arith.constant 0 : i32
    return %c0_i32, %c0_i32_0 : i32, i32
  }
  func.func @transform_5(%arg0: i32) -> (i32, i32) {
    %c0_i32 = arith.constant 0 : i32
    %c0_i32_0 = arith.constant 0 : i32
    %c0_i32_1 = arith.constant 0 : i32
    return %c0_i32, %c0_i32_0 : i32, i32
  }
  func.func @transform_6(%arg0: i32) -> (i32, i32) {
    %c0_i32 = arith.constant 0 : i32
    %c0_i32_0 = arith.constant 0 : i32
    %c0_i32_1 = arith.constant 0 : i32
    return %c0_i32, %c0_i32_0 : i32, i32
  }
  func.func @transform_7(%arg0: i32) -> (i32, i32) {
    %c0_i32 = arith.constant 0 : i32
    %c0_i32_0 = arith.constant 0 : i32
    %c0_i32_1 = arith.constant 0 : i32
    return %c0_i32, %c0_i32_0 : i32, i32
  }
  func.func @transform_8(%arg0: i32) -> (i32, i32) {
    %c0_i32 = arith.constant 0 : i32
    %c0_i32_0 = arith.constant 0 : i32
    %c0_i32_1 = arith.constant 0 : i32
    return %c0_i32, %c0_i32_0 : i32, i32
  }
  func.func @transform_9(%arg0: i32) -> (i32, i32) {
    %c0_i32 = arith.constant 0 : i32
    %c0_i32_0 = arith.constant 0 : i32
    return %arg0, %c0_i32 : i32, i32
  }
}

</mosaic_0001>

<bundles_post_ra>
// kernel: inverse_model.1
= control target key start
LH: loop header
LB: loop body
LE: loop exit
PB: predicated region body
PF: predicated region fallthrough
CT: control target
= control target key end

     0   :  { %v1170_v2 = vmov 0.0   ;;  %s1615_s0 = inlined_call_operand.vmem [shape: f32[72,64], index: 0, kind: input, shape index: {}]   ;;  %s1616_s1 = inlined_call_operand.vmem [shape: f32[72,64], index: 1, kind: input, shape index: {}]   ;;  %s1617_s2 = inlined_call_operand.vmem [shape: f32[64,128], index: 2, kind: input, shape index: {}]   ;;  %s1618_s3 = inlined_call_operand.vmem [shape: f32[64,128], index: 3, kind: input, shape index: {}]   ;;  %s1619_s4 = inlined_call_operand.vmem [shape: f32[1,128], index: 4, kind: input, shape index: {}]   ;;  %s1620_s5 = inlined_call_operand.vmem [shape: f32[128,128], index: 5, kind: input, shape index: {}]   ;;  %s1621_s6 = inlined_call_operand.vmem [shape: f32[1,128], index: 6, kind: input, shape index: {}]   ;;  %s1622_s7 = inlined_call_operand.vmem [shape: f32[128,121], index: 7, kind: input, shape index: {}]   ;;  %s1623_s8 = inlined_call_operand.vmem [shape: f32[1,121], index: 8, kind: input, shape index: {}]   ;;  %s1624_s9 = inlined_call_operand.hbm [shape: f32[72,121], index: 9, kind: output, shape index: {}]  }
   0x1   :  { %v66_v0 = vld [vmem:[%s1618_s3 + $0x38] sm:$0xff]  ;;  %902 = vmatprep.subr.mxu0 %v1170_v2  ;;  %945 = vmatprep.subr.mxu1 %v1170_v2  ;;  %v65_v3 = vld [vmem:[%s1618_s3 + $0x30] sm:$0xff]  ;;  %v64_v5 = vld [vmem:[%s1618_s3 + $0x28] sm:$0xff] }
   0x2   :  { %v49_v1 = vld [vmem:[%s1617_s2 + $0x38] sm:$0xff]  ;;  %v48_v4 = vld [vmem:[%s1617_s2 + $0x30] sm:$0xff]  ;;  %903 = vmatpush3.msra.mxu0 %v66_v0  ;;  %v47_v6 = vld [vmem:[%s1617_s2 + $0x28] sm:$0xff] }
   0x3   :  { %946 = vmatpush3.msra.mxu1 %v49_v1  ;;  %904 = vmatprep.subr.mxu0 %v1170_v2  ;;  %v63_v7 = vld [vmem:[%s1618_s3 + $0x20] sm:$0xff]  ;;  %v62_v9 = vld [vmem:[%s1618_s3 + $0x18] sm:$0xff]  ;;  %v61_v11 = vld [vmem:[%s1618_s3 + $0x10] sm:$0xff] }
   0x4   :  { %947 = vmatprep.subr.mxu1 %v1170_v2  ;;  %905 = vmatpush3.msra.mxu0 %v65_v3  ;;  %v46_v8 = vld [vmem:[%s1617_s2 + $0x20] sm:$0xff]  ;;  %v45_v10 = vld [vmem:[%s1617_s2 + $0x18] sm:$0xff]  ;;  %v44_v12 = vld [vmem:[%s1617_s2 + $0x10] sm:$0xff] }
   0x5   :  { %948 = vmatpush3.msra.mxu1 %v48_v4  ;;  %906 = vmatprep.subr.mxu0 %v1170_v2  ;;  %v60_v13 = vld [vmem:[%s1618_s3 + $0x8] sm:$0xff]  ;;  %v59_v15 = vld [vmem:[%s1618_s3] sm:$0xff] }
   0x6   :  { %949 = vmatprep.subr.mxu1 %v1170_v2  ;;  %907 = vmatpush3.msra.mxu0 %v64_v5  ;;  %v43_v14 = vld [vmem:[%s1617_s2 + $0x8] sm:$0xff] }
   0x7   :  { %950 = vmatpush3.msra.mxu1 %v47_v6  ;;  %908 = vmatprep.subr.mxu0 %v1170_v2 }
   0x8   :  { %951 = vmatprep.subr.mxu1 %v1170_v2  ;;  %909 = vmatpush3.msra.mxu0 %v63_v7 }
   0x9   :  { %952 = vmatpush3.msra.mxu1 %v46_v8  ;;  %910 = vmatprep.subr.mxu0 %v1170_v2 }
   0xa   :  { %953 = vmatprep.subr.mxu1 %v1170_v2  ;;  %911 = vmatpush3.msra.mxu0 %v62_v9 }
   0xb   :  { %954 = vmatpush3.msra.mxu1 %v45_v10  ;;  %912 = vmatprep.subr.mxu0 %v1170_v2 }
   0xc   :  { %955 = vmatprep.subr.mxu1 %v1170_v2  ;;  %913 = vmatpush3.msra.mxu0 %v61_v11 }
   0xd   :  { %956 = vmatpush3.msra.mxu1 %v44_v12  ;;  %914 = vmatprep.subr.mxu0 %v1170_v2 }
   0xe   :  { %957 = vmatprep.subr.mxu1 %v1170_v2 }
   0xf   :  { %14 = vsyncpa [#allocation3], 0  ;;  %915 = vmatpush3.msra.mxu0 %v60_v13  ;;  %958 = vmatpush3.msra.mxu1 %v43_v14  ;;  %v42_v16 = vld [vmem:[%s1617_s2] sm:$0xff]  ;;  %vm67_vm0 = vcmask 523264   ;;  %vm1171_vm1 = vmmov 0   ;;  %v418_v19 = vld [vmem:[%s1620_s5 + $0x78] sm:$0xff] }
  0x10   :  { %916 = vmatprep.subr.mxu0 %v1170_v2  ;;  %959 = vmatprep.subr.mxu1 %v1170_v2  ;;  %v50_v17 = vld [vmem:[%s1616_s1] sm:$0xff]  ;;  %v51_v20 = vld [vmem:[%s1616_s1 + $0x8] sm:$0xff]  ;;  %v417_v22 = vld [vmem:[%s1620_s5 + $0x70] sm:$0xff] }
  0x11   :  { %v33_v18 = vld [vmem:[%s1615_s0] sm:$0xff]  ;;  %917 = vmatpush3.msra.mxu0 %v59_v15  ;;  %918 = vmatprep.mubr.msk.f32.mxu0 %vm1171_vm1, %v1170_v2  ;;  %v34_v21 = vld [vmem:[%s1615_s0 + $0x8] sm:$0xff]  ;;  %v52_v23 = vld [vmem:[%s1616_s1 + $0x10] sm:$0xff] }
  0x12   :  { %960 = vmatpush3.msra.mxu1 %v42_v16  ;;  %961 = vmatprep.mubr.msk.f32.mxu1 %vm1171_vm1, %v1170_v2  ;;  %v35_v24 = vld [vmem:[%s1615_s0 + $0x10] sm:$0xff]  ;;  %v416_v25 = vld [vmem:[%s1620_s5 + $0x68] sm:$0xff]  ;;  %v53_v26 = vld [vmem:[%s1616_s1 + $0x18] sm:$0xff] }
  0x13   :  { %919 = vmatmul.mubr.msk.f32.vlgmr.msra.gmra.mxu0 %vm67_vm0, %v50_v17  ;;  %962 = vmatmul.mubr.msk.f32.vlgmr.msra.gmra.mxu1 %vm67_vm0, %v33_v18  ;;  %v36_v27 = vld [vmem:[%s1615_s0 + $0x18] sm:$0xff]  ;;  %v415_v28 = vld [vmem:[%s1620_s5 + $0x60] sm:$0xff]  ;;  %v55_v32 = vld [vmem:[%s1616_s1 + $0x28] sm:$0xff] }
  0x14   :  { %921 = vmatprep.mubr.msk.f32.mxu0 %vm1171_vm1, %v1170_v2  ;;  %964 = vmatprep.mubr.msk.f32.mxu1 %vm1171_vm1, %v1170_v2  ;;  %v54_v29 = vld [vmem:[%s1616_s1 + $0x20] sm:$0xff]  ;;  %v414_v31 = vld [vmem:[%s1620_s5 + $0x58] sm:$0xff]  ;;  %v38_v33 = vld [vmem:[%s1615_s0 + $0x28] sm:$0xff] }
  0x15   :  { %988 = vmatprep.subr.mxu0 %v1170_v2  ;;  %1047 = vmatprep.subr.mxu1 %v1170_v2  ;;  %v37_v30 = vld [vmem:[%s1615_s0 + $0x20] sm:$0xff]  ;;  %v56_v34 = vld [vmem:[%s1616_s1 + $0x30] sm:$0xff]  ;;  %v57_v36 = vld [vmem:[%s1616_s1 + $0x38] sm:$0xff] }
  0x16   :  { %989 = vmatpush3.msra.mxu0 %v418_v19  ;;  %v39_v35 = vld [vmem:[%s1615_s0 + $0x30] sm:$0xff]  ;;  %v40_v37 = vld [vmem:[%s1615_s0 + $0x38] sm:$0xff]  ;;  %v58_v38 = vld [vmem:[%s1616_s1 + $0x40] sm:$0xff] }
  0x17   :  { %922 = vmatmul.mubr.msk.f32.gmra.mxu0 %vm67_vm0, %v51_v20  ;;  %965 = vmatmul.mubr.msk.f32.gmra.mxu1 %vm67_vm0, %v34_v21  ;;  %v41_v39 = vld [vmem:[%s1615_s0 + $0x40] sm:$0xff]  ;;  %v413_v40 = vld [vmem:[%s1620_s5 + $0x50] sm:$0xff]  ;;  %v412_v41 = vld [vmem:[%s1620_s5 + $0x48] sm:$0xff] }
  0x18   :  { %924 = vmatprep.mubr.msk.f32.mxu0 %vm1171_vm1, %v1170_v2  ;;  %967 = vmatprep.mubr.msk.f32.mxu1 %vm1171_vm1, %v1170_v2  ;;  %v411_v42 = vld [vmem:[%s1620_s5 + $0x40] sm:$0xff]  ;;  %v410_v43 = vld [vmem:[%s1620_s5 + $0x38] sm:$0xff]  ;;  %v409_v44 = vld [vmem:[%s1620_s5 + $0x30] sm:$0xff] }
  0x19   :  { %990 = vmatprep.subr.mxu0 %v1170_v2  ;;  %v408_v45 = vld [vmem:[%s1620_s5 + $0x28] sm:$0xff]  ;;  %v407_v46 = vld [vmem:[%s1620_s5 + $0x20] sm:$0xff]  ;;  %v406_v47 = vld [vmem:[%s1620_s5 + $0x18] sm:$0xff] }
  0x1a   :  { %991 = vmatpush3.msra.mxu0 %v417_v22  ;;  %v405_v48 = vld [vmem:[%s1620_s5 + $0x10] sm:$0xff]  ;;  %v404_v49 = vld [vmem:[%s1620_s5 + $0x8] sm:$0xff]  ;;  %v403_v50 = vld [vmem:[%s1620_s5] sm:$0xff] }
  0x1b   :  { %925 = vmatmul.mubr.msk.f32.gmra.mxu0 %vm67_vm0, %v52_v23  ;;  %968 = vmatmul.mubr.msk.f32.gmra.mxu1 %vm67_vm0, %v35_v24  ;;  %v596_v51 = vld [vmem:[%s1622_s7 + $0x78] sm:$0xff]  ;;  %v595_v52 = vld [vmem:[%s1622_s7 + $0x70] sm:$0xff]  ;;  %v594_v53 = vld [vmem:[%s1622_s7 + $0x68] sm:$0xff] }
  0x1c   :  { %927 = vmatprep.mubr.msk.f32.mxu0 %vm1171_vm1, %v1170_v2  ;;  %970 = vmatprep.mubr.msk.f32.mxu1 %vm1171_vm1, %v1170_v2  ;;  %v593_v54 = vld [vmem:[%s1622_s7 + $0x60] sm:$0xff]  ;;  %v592_v55 = vld [vmem:[%s1622_s7 + $0x58] sm:$0xff]  ;;  %v591_v56 = vld [vmem:[%s1622_s7 + $0x50] sm:$0xff] }
  0x1d   :  { %992 = vmatprep.subr.mxu0 %v1170_v2  ;;  %1048 = vmatpush3.msra.mxu1 %v596_v51  ;;  %v1494_v59 = vld [vmem:[%s1619_s4] ss:$0 sm:$0xff] }
  0x1e   :  { %993 = vmatpush3.msra.mxu0 %v416_v25  ;;  %1049 = vmatprep.subr.mxu1 %v1170_v2 }
  0x1f   :  { %928 = vmatmul.mubr.msk.f32.gmra.mxu0 %vm67_vm0, %v53_v26  ;;  %971 = vmatmul.mubr.msk.f32.gmra.mxu1 %vm67_vm0, %v36_v27 }
  0x20   :  { %930 = vmatprep.mubr.msk.f32.mxu0 %vm1171_vm1, %v1170_v2  ;;  %973 = vmatprep.mubr.msk.f32.mxu1 %vm1171_vm1, %v1170_v2 }
  0x21   :  { %994 = vmatprep.subr.mxu0 %v1170_v2  ;;  %1050 = vmatpush3.msra.mxu1 %v595_v52 }
  0x22   :  { %995 = vmatpush3.msra.mxu0 %v415_v28  ;;  %1051 = vmatprep.subr.mxu1 %v1170_v2 }
  0x23   :  { %931 = vmatmul.mubr.msk.f32.gmra.mxu0 %vm67_vm0, %v54_v29  ;;  %974 = vmatmul.mubr.msk.f32.gmra.mxu1 %vm67_vm0, %v37_v30 }
  0x24   :  { %933 = vmatprep.mubr.msk.f32.mxu0 %vm1171_vm1, %v1170_v2  ;;  %976 = vmatprep.mubr.msk.f32.mxu1 %vm1171_vm1, %v1170_v2 }
  0x25   :  { %996 = vmatprep.subr.mxu0 %v1170_v2  ;;  %1052 = vmatpush3.msra.mxu1 %v594_v53 }
  0x26   :  { %997 = vmatpush3.msra.mxu0 %v414_v31  ;;  %1053 = vmatprep.subr.mxu1 %v1170_v2 }
  0x27   :  { %934 = vmatmul.mubr.msk.f32.gmra.mxu0 %vm67_vm0, %v55_v32  ;;  %977 = vmatmul.mubr.msk.f32.gmra.mxu1 %vm67_vm0, %v38_v33 }
  0x28   :  { %936 = vmatprep.mubr.msk.f32.mxu0 %vm1171_vm1, %v1170_v2  ;;  %979 = vmatprep.mubr.msk.f32.mxu1 %vm1171_vm1, %v1170_v2 }
  0x29   :  { %998 = vmatprep.subr.mxu0 %v1170_v2  ;;  %1054 = vmatpush3.msra.mxu1 %v593_v54 }
  0x2a   :  { %999 = vmatpush3.msra.mxu0 %v413_v40  ;;  %1055 = vmatprep.subr.mxu1 %v1170_v2 }
  0x2b   :  { %937 = vmatmul.mubr.msk.f32.gmra.mxu0 %vm67_vm0, %v56_v34  ;;  %980 = vmatmul.mubr.msk.f32.gmra.mxu1 %vm67_vm0, %v39_v35 }
  0x2c   :  { %939 = vmatprep.mubr.msk.f32.mxu0 %vm1171_vm1, %v1170_v2  ;;  %982 = vmatprep.mubr.msk.f32.mxu1 %vm1171_vm1, %v1170_v2 }
  0x2d   :  { %1000 = vmatprep.subr.mxu0 %v1170_v2  ;;  %1056 = vmatpush3.msra.mxu1 %v592_v55 }
  0x2e   :  { %1001 = vmatpush3.msra.mxu0 %v412_v41  ;;  %1057 = vmatprep.subr.mxu1 %v1170_v2 }
  0x2f   :  { %940 = vmatmul.mubr.msk.f32.gmra.mxu0 %vm67_vm0, %v57_v36  ;;  %983 = vmatmul.mubr.msk.f32.gmra.mxu1 %vm67_vm0, %v40_v37 }
  0x30   :  { %942 = vmatprep.mubr.msk.f32.mxu0 %vm1171_vm1, %v1170_v2  ;;  %985 = vmatprep.mubr.msk.f32.mxu1 %vm1171_vm1, %v1170_v2 }
  0x31   :  { %1002 = vmatprep.subr.mxu0 %v1170_v2  ;;  %1058 = vmatpush3.msra.mxu1 %v591_v56 }
  0x32   :  { %1003 = vmatpush3.msra.mxu0 %v411_v42  ;;  %1059 = vmatprep.subr.mxu1 %v1170_v2 }
  0x33   :  { %943 = vmatmul.mubr.msk.f32.gmra.mxu0 %vm67_vm0, %v58_v38  ;;  %986 = vmatmul.mubr.msk.f32.gmra.mxu1 %vm67_vm0, %v41_v39 }
  0x34   :  { %1020 = vmatprep.mubr.msk.f32.mxu0 %vm1171_vm1, %v1170_v2  ;;  %1079 = vmatprep.mubr.msk.f32.mxu1 %vm1171_vm1, %v1170_v2 }
  0x35   :  { %1004 = vmatprep.subr.mxu0 %v1170_v2 }
  0x36   :  { %1005 = vmatpush3.msra.mxu0 %v410_v43 }
  0x37   :  { %1006 = vmatprep.subr.mxu0 %v1170_v2 }
  0x38   :  { %1007 = vmatpush3.msra.mxu0 %v409_v44 }
  0x39   :  { %1008 = vmatprep.subr.mxu0 %v1170_v2 }
  0x3a   :  { %1009 = vmatpush3.msra.mxu0 %v408_v45 }
  0x3b   :  { %1010 = vmatprep.subr.mxu0 %v1170_v2 }
  0x3c   :  { %1011 = vmatpush3.msra.mxu0 %v407_v46 }
  0x3d   :  { %1012 = vmatprep.subr.mxu0 %v1170_v2 }
  0x3e   :  { %1013 = vmatpush3.msra.mxu0 %v406_v47 }
  0x3f   :  { %1014 = vmatprep.subr.mxu0 %v1170_v2 }
  0x40   :  { %1015 = vmatpush3.msra.mxu0 %v405_v48 }
  0x41   :  { %1016 = vmatprep.subr.mxu0 %v1170_v2 }
  0x42   :  { %1017 = vmatpush3.msra.mxu0 %v404_v49 }
  0x43   :  { %1018 = vmatprep.subr.mxu0 %v1170_v2 }
  0x44   :  { %1019 = vmatpush3.msra.mxu0 %v403_v50 }
  0xd3   :  { %v161_v57 = vpop.f32.mrf.mxu0  ;;  %v298_v58 = vpop.f32.mrf.mxu1 }
  0xd4   :  { %v299_v60 = vadd.f32 %v298_v58, %v161_v57 }
  0xd5   :  { %v920_v61 = vpop.f32.mrf.mxu0  ;;  %v963_v62 = vpop.f32.mrf.mxu1 }
  0xd6   :  { %v349_v63 = vadd.f32 %v1494_v59, %v299_v60 }
  0xd7   :  { %v166_v0 = vpop.f32.mrf.mxu0  ;;  %v303_v1 = vpop.f32.mrf.mxu1 }
  0xd8   :  { %v367_v3 = vmul.f32 1.442695, %v349_v63  ;;  %v304_v4 = vadd.f32 %v303_v1, %v166_v0  ;;  %vm358_vm2 = vcmp.gt.f32.partialorder %v349_v63, 0.0 }
  0xd9   :  { %v923_v5 = vpop.f32.mrf.mxu0  ;;  %v966_v6 = vpop.f32.mrf.mxu1 }
  0xda   :  { %1112 = vpow2.f32 %v367_v3  ;;  %v350_v7 = vadd.f32 %v1494_v59, %v304_v4 }
  0xdb   :  { %v171_v8 = vpop.f32.mrf.mxu0  ;;  %v308_v9 = vpop.f32.mrf.mxu1 }
  0xdc   :  { %v369_v10 = vmul.f32 1.442695, %v350_v7  ;;  %v309_v11 = vadd.f32 %v308_v9, %v171_v8  ;;  %vm359_vm3 = vcmp.gt.f32.partialorder %v350_v7, 0.0 }
  0xdd   :  { %v926_v12 = vpop.f32.mrf.mxu0  ;;  %v969_v13 = vpop.f32.mrf.mxu1 }
  0xde   :  { %1114 = vpow2.f32 %v369_v10  ;;  %v351_v14 = vadd.f32 %v1494_v59, %v309_v11 }
  0xdf   :  { %v176_v15 = vpop.f32.mrf.mxu0  ;;  %v313_v16 = vpop.f32.mrf.mxu1 }
  0xe0   :  { %v371_v17 = vmul.f32 1.442695, %v351_v14  ;;  %v314_v18 = vadd.f32 %v313_v16, %v176_v15  ;;  %vm360_vm4 = vcmp.gt.f32.partialorder %v351_v14, 0.0 }
  0xe1   :  { %v929_v19 = vpop.f32.mrf.mxu0  ;;  %v972_v20 = vpop.f32.mrf.mxu1 }
  0xe2   :  { %1116 = vpow2.f32 %v371_v17  ;;  %v1500_v21 = vadd.f32 %v1494_v59, %v314_v18 }
  0xe3   :  { %v181_v22 = vpop.f32.mrf.mxu0  ;;  %v318_v23 = vpop.f32.mrf.mxu1 }
  0xe4   :  { %v373_v24 = vmul.f32 1.442695, %v1500_v21  ;;  %v319_v25 = vadd.f32 %v318_v23, %v181_v22  ;;  %vm361_vm5 = vcmp.gt.f32.partialorder %v1500_v21, 0.0  ;;  %v590_v22 = vld [vmem:[%s1622_s7 + $0x48] sm:$0xff]  ;;  %v589_v23 = vld [vmem:[%s1622_s7 + $0x40] sm:$0xff] }
  0xe5   :  { %v932_v26 = vpop.f32.mrf.mxu0  ;;  %v975_v27 = vpop.f32.mrf.mxu1  ;;  %1060 = vmatpush3.msra.mxu1 %v590_v22 }
  0xe6   :  { %1118 = vpow2.f32 %v373_v24  ;;  %v1504_v28 = vadd.f32 %v1494_v59, %v319_v25  ;;  %1061 = vmatprep.subr.mxu1 %v1170_v2  ;;  %v588_v24 = vld [vmem:[%s1622_s7 + $0x38] sm:$0xff]  ;;  %v587_v25 = vld [vmem:[%s1622_s7 + $0x30] sm:$0xff]  ;;  %v586_v26 = vld [vmem:[%s1622_s7 + $0x28] sm:$0xff] }
  0xe7   :  { %v1113_v29 = vpop.eup %1112  ;;  %v186_v30 = vpop.f32.mrf.mxu0  ;;  %1062 = vmatpush3.msra.mxu1 %v589_v23  ;;  %v585_v27 = vld [vmem:[%s1622_s7 + $0x20] sm:$0xff] }
  0xe8   :  { %v323_v31 = vpop.f32.mrf.mxu1  ;;  %v375_v32 = vmul.f32 1.442695, %v1504_v28  ;;  %v798_v34 = vadd.f32 -1.0, %v1113_v29  ;;  %vm362_vm6 = vcmp.gt.f32.partialorder %v1504_v28, 0.0  ;;  %1063 = vmatprep.subr.mxu1 %v1170_v2  ;;  %v583_v29 = vld [vmem:[%s1622_s7 + $0x10] sm:$0xff] }
  0xe9   :  { %v324_v33 = vadd.f32 %v323_v31, %v186_v30  ;;  %v935_v35 = vpop.f32.mrf.mxu0  ;;  %1064 = vmatpush3.msra.mxu1 %v588_v24  ;;  %v582_v30 = vld [vmem:[%s1622_s7 + $0x8] sm:$0xff]  ;;  %v581_v31 = vld [vmem:[%s1622_s7] sm:$0xff] }
  0xea   :  { %v978_v36 = vpop.f32.mrf.mxu1  ;;  %1120 = vpow2.f32 %v375_v32  ;;  %v394_v38 = vsel %vm358_vm2, %v349_v63, %v798_v34  ;;  %1065 = vmatprep.subr.mxu1 %v1170_v2  ;;  %v1573_v32 = vld [vmem:[%s1621_s6] ss:$0 sm:$0xff] }
  0xeb   :  { %v354_v37 = vadd.f32 %v1494_v59, %v324_v33  ;;  %v1115_v39 = vpop.eup %1114  ;;  %v191_v40 = vpop.f32.mrf.mxu0  ;;  %1021 = vmatmul.mubr.f32.vlgmr.msra.gmra.mxu0 %v394_v38  ;;  %1066 = vmatpush3.msra.mxu1 %v587_v25 }
  0xec   :  { %v328_v41 = vpop.f32.mrf.mxu1  ;;  %1023 = vmatprep.mubr.msk.f32.mxu0 %vm1171_vm1, %v1170_v2  ;;  %v799_v44 = vadd.f32 -1.0, %v1115_v39  ;;  %1067 = vmatprep.subr.mxu1 %v1170_v2 }
  0xed   :  { %v377_v42 = vmul.f32 1.442695, %v354_v37  ;;  %v329_v43 = vadd.f32 %v328_v41, %v191_v40  ;;  %v938_v45 = vpop.f32.mrf.mxu0  ;;  %vm363_vm7 = vcmp.gt.f32.partialorder %v354_v37, 0.0  ;;  %1068 = vmatpush3.msra.mxu1 %v586_v26 }
  0xee   :  { %v981_v46 = vpop.f32.mrf.mxu1  ;;  %v395_v48 = vsel %vm359_vm3, %v350_v7, %v799_v44  ;;  %1069 = vmatprep.subr.mxu1 %v1170_v2 }
  0xef   :  { %1122 = vpow2.f32 %v377_v42  ;;  %v355_v47 = vadd.f32 %v1494_v59, %v329_v43  ;;  %v1117_v49 = vpop.eup %1116  ;;  %v196_v50 = vpop.f32.mrf.mxu0  ;;  %1024 = vmatmul.mubr.f32.gmra.mxu0 %v395_v48  ;;  %1070 = vmatpush3.msra.mxu1 %v585_v27 }
  0xf0   :  { %v333_v51 = vpop.f32.mrf.mxu1  ;;  %1026 = vmatprep.mubr.msk.f32.mxu0 %vm1171_vm1, %v1170_v2  ;;  %v800_v54 = vadd.f32 -1.0, %v1117_v49  ;;  %1071 = vmatprep.subr.mxu1 %v1170_v2 }
  0xf1   :  { %v379_v52 = vmul.f32 1.442695, %v355_v47  ;;  %v334_v53 = vadd.f32 %v333_v51, %v196_v50  ;;  %v941_v55 = vpop.f32.mrf.mxu0  ;;  %vm364_vm8 = vcmp.gt.f32.partialorder %v355_v47, 0.0 }
  0xf2   :  { %v984_v56 = vpop.f32.mrf.mxu1  ;;  %v396_v58 = vsel %vm360_vm4, %v351_v14, %v800_v54 }
  0xf3   :  { %1124 = vpow2.f32 %v379_v52  ;;  %v356_v57 = vadd.f32 %v1494_v59, %v334_v53  ;;  %v1119_v60 = vpop.eup %1118  ;;  %v201_v61 = vpop.f32.mrf.mxu0  ;;  %1027 = vmatmul.mubr.f32.gmra.mxu0 %v396_v58 }
  0xf4   :  { %v338_v62 = vpop.f32.mrf.mxu1  ;;  %1029 = vmatprep.mubr.msk.f32.mxu0 %vm1171_vm1, %v1170_v2  ;;  %v801_v1 = vadd.f32 -1.0, %v1119_v60 }
  0xf5   :  { %v381_v63 = vmul.f32 1.442695, %v356_v57  ;;  %v339_v0 = vadd.f32 %v338_v62, %v201_v61  ;;  %v944_v3 = vpop.f32.mrf.mxu0  ;;  %vm365_vm9 = vcmp.gt.f32.partialorder %v356_v57, 0.0 }
  0xf6   :  { %v987_v4 = vpop.f32.mrf.mxu1  ;;  %v397_v6 = vsel %vm361_vm5, %v1500_v21, %v801_v1  ;;  %vm753_vm5 = vcmask 990208  }
  0xf7   :  { %1126 = vpow2.f32 %v381_v63  ;;  %v357_v5 = vadd.f32 %v1494_v59, %v339_v0  ;;  %v1121_v7 = vpop.eup %1120  ;;  %1030 = vmatmul.mubr.f32.gmra.mxu0 %v397_v6 }
  0xf8   :  { %1032 = vmatprep.mubr.msk.f32.mxu0 %vm1171_vm1, %v1170_v2  ;;  %v802_v9 = vadd.f32 -1.0, %v1121_v7 }
  0xf9   :  { %v383_v8 = vmul.f32 1.442695, %v357_v5  ;;  %vm366_vm10 = vcmp.gt.f32.partialorder %v357_v5, 0.0 }
  0xfa   :  { %v398_v10 = vsel %vm362_vm6, %v1504_v28, %v802_v9  ;;  %v584_v28 = vld [vmem:[%s1622_s7 + $0x18] sm:$0xff] }
  0xfb   :  { %1128 = vpow2.f32 %v383_v8  ;;  %1033 = vmatmul.mubr.f32.gmra.mxu0 %v398_v10  ;;  %1072 = vmatpush3.msra.mxu1 %v584_v28 }
  0xfc   :  { %v1123_v11 = vpop.eup %1122  ;;  %1035 = vmatprep.mubr.msk.f32.mxu0 %vm1171_vm1, %v1170_v2  ;;  %1073 = vmatprep.subr.mxu1 %v1170_v2 }
  0xfd   :  { %v803_v59 = vadd.f32 -1.0, %v1123_v11  ;;  %1074 = vmatpush3.msra.mxu1 %v583_v29 }
  0xfe   :  { %1075 = vmatprep.subr.mxu1 %v1170_v2 }
  0xff   :  { %v399_v12 = vsel %vm363_vm7, %v354_v37, %v803_v59  ;;  %1076 = vmatpush3.msra.mxu1 %v582_v30 }
 0x100   :  { %v1125_v13 = vpop.eup %1124  ;;  %1036 = vmatmul.mubr.f32.gmra.mxu0 %v399_v12  ;;  %1077 = vmatprep.subr.mxu1 %v1170_v2 }
 0x101   :  { %1038 = vmatprep.mubr.msk.f32.mxu0 %vm1171_vm1, %v1170_v2  ;;  %v804_v14 = vadd.f32 -1.0, %v1125_v13  ;;  %1078 = vmatpush3.msra.mxu1 %v581_v31 }
 0x103   :  { %v400_v15 = vsel %vm364_vm8, %v355_v47, %v804_v14 }
 0x104   :  { %v1127_v16 = vpop.eup %1126  ;;  %1039 = vmatmul.mubr.f32.gmra.mxu0 %v400_v15 }
 0x105   :  { %1041 = vmatprep.mubr.msk.f32.mxu0 %vm1171_vm1, %v1170_v2  ;;  %v805_v17 = vadd.f32 -1.0, %v1127_v16 }
 0x107   :  { %v401_v18 = vsel %vm365_vm9, %v356_v57, %v805_v17 }
 0x108   :  { %v1129_v19 = vpop.eup %1128  ;;  %1042 = vmatmul.mubr.f32.gmra.mxu0 %v401_v18 }
 0x109   :  { %1044 = vmatprep.mubr.msk.f32.mxu0 %vm1171_vm1, %v1170_v2  ;;  %v806_v20 = vadd.f32 -1.0, %v1129_v19 }
 0x10b   :  { %v402_v21 = vsel %vm366_vm10, %v357_v5, %v806_v20 }
 0x10c   :  { %1045 = vmatmul.mubr.f32.gmra.mxu0 %v402_v21 }
 0x1ab   :  { %v492_v33 = vpop.f32.mrf.mxu0 }
 0x1ac   :  { %v493_v34 = vadd.f32 %v1573_v32, %v492_v33  ;;  %v1172_v33 = vmov -1.0  }
 0x1ad   :  { %v1022_v35 = vpop.f32.mrf.mxu0  ;;  %762 = vst.msk [vmem:[#allocation2 + $0x40] sm:$0xff] %vm753_vm5, %v1172_v33 }
 0x1ae   :  { %v545_v36 = vmul.f32 1.442695, %v493_v34  ;;  %vm536_vm11 = vcmp.gt.f32.partialorder %v493_v34, 0.0 }
 0x1af   :  { %v497_v37 = vpop.f32.mrf.mxu0 }
 0x1b0   :  { %1130 = vpow2.f32 %v545_v36  ;;  %v498_v38 = vadd.f32 %v1573_v32, %v497_v37 }
 0x1b1   :  { %v1025_v39 = vpop.f32.mrf.mxu0 }
 0x1b2   :  { %v547_v40 = vmul.f32 1.442695, %v498_v38  ;;  %vm537_vm12 = vcmp.gt.f32.partialorder %v498_v38, 0.0 }
 0x1b3   :  { %v502_v41 = vpop.f32.mrf.mxu0 }
 0x1b4   :  { %1132 = vpow2.f32 %v547_v40  ;;  %v503_v42 = vadd.f32 %v1573_v32, %v502_v41 }
 0x1b5   :  { %v1028_v43 = vpop.f32.mrf.mxu0 }
 0x1b6   :  { %v549_v44 = vmul.f32 1.442695, %v503_v42  ;;  %vm538_vm13 = vcmp.gt.f32.partialorder %v503_v42, 0.0 }
 0x1b7   :  { %v507_v45 = vpop.f32.mrf.mxu0 }
 0x1b8   :  { %1134 = vpow2.f32 %v549_v44  ;;  %v508_v46 = vadd.f32 %v1573_v32, %v507_v45 }
 0x1b9   :  { %v1031_v47 = vpop.f32.mrf.mxu0 }
 0x1ba   :  { %v551_v48 = vmul.f32 1.442695, %v508_v46  ;;  %vm539_vm14 = vcmp.gt.f32.partialorder %v508_v46, 0.0 }
 0x1bb   :  { %v512_v49 = vpop.f32.mrf.mxu0 }
 0x1bc   :  { %1136 = vpow2.f32 %v551_v48  ;;  %v513_v50 = vadd.f32 %v1573_v32, %v512_v49 }
 0x1bd   :  { %v1131_v51 = vpop.eup %1130  ;;  %v1034_v52 = vpop.f32.mrf.mxu0 }
 0x1be   :  { %v808_v53 = vadd.f32 -1.0, %v1131_v51  ;;  %v553_v54 = vmul.f32 1.442695, %v513_v50  ;;  %vm540_vm15 = vcmp.gt.f32.partialorder %v513_v50, 0.0 }
 0x1c0   :  { %v517_v55 = vpop.f32.mrf.mxu0  ;;  %v572_v56 = vsel %vm536_vm11, %v493_v34, %v808_v53  ;;  %1138 = vpow2.f32 %v553_v54  ;;  %v817_v34 = vld [vmem:[%s1623_s8] ss:$0 sm:$0xff]  ;;  %s1173_s8 = smov [#allocation2]  }
 0x1c1   :  { %v518_v57 = vadd.f32 %v1573_v32, %v517_v55  ;;  %v1133_v58 = vpop.eup %1132  ;;  %1080 = vmatmul.mubr.f32.vlgmr.msra.gmra.mxu1 %v572_v56  ;;  %s768_s23 = sshll.u32 %s1173_s8, 4  ;;  %s769_s23 = int_to_ptr.vmem [resolvable:$true] %s768_s23 }
 0x1c2   :  { %v1037_v60 = vpop.f32.mrf.mxu0  ;;  %1082 = vmatprep.mubr.msk.f32.mxu1 %vm1171_vm1, %v1170_v2  ;;  %v809_v62 = vadd.f32 -1.0, %v1133_v58  ;;  %s1148_s2 = scalar_lea.vmem %s769_s23, 1152  ;;  %p1153_p1 = scmp.lt.s32.totalorder %s769_s23, %s769_s23 }
 0x1c3   :  { %v555_v61 = vmul.f32 1.442695, %v518_v57  ;;  %vm541_vm0 = vcmp.gt.f32.partialorder %v518_v57, 0.0  ;;  %p1149_p0 = scmp.ne.s32.totalorder %s769_s23, %s1148_s2  ;;  %p1154_p2 = scmp.lt.s32.totalorder %s1148_s2, %s1148_s2 }
 0x1c4   :  { %v522_v63 = vpop.f32.mrf.mxu0  ;;  %v573_v1 = vsel %vm537_vm12, %v498_v38, %v809_v62 }
 0x1c5   :  { %1140 = vpow2.f32 %v555_v61  ;;  %v523_v0 = vadd.f32 %v1573_v32, %v522_v63  ;;  %v1135_v3 = vpop.eup %1134  ;;  %1083 = vmatmul.mubr.f32.gmra.mxu1 %v573_v1  ;;  %p1155_p3 = por %p1154_p2, %p1153_p1 }
 0x1c6   :  { %v1040_v4 = vpop.f32.mrf.mxu0  ;;  %1085 = vmatprep.mubr.msk.f32.mxu1 %vm1171_vm1, %v1170_v2  ;;  %v810_v6 = vadd.f32 -1.0, %v1135_v3 }
 0x1c7   :  { %v557_v5 = vmul.f32 1.442695, %v523_v0  ;;  %vm542_vm2 = vcmp.gt.f32.partialorder %v523_v0, 0.0  ;;  %p1156_p4 = pnand %p1155_p3, %p1149_p0 }
 0x1c8   :  { %v527_v7 = vpop.f32.mrf.mxu0  ;;  %v574_v9 = vsel %vm538_vm13, %v503_v42, %v810_v6 }
 0x1c9   :  { %1142 = vpow2.f32 %v557_v5  ;;  %v528_v8 = vadd.f32 %v1573_v32, %v527_v7  ;;  %v1137_v10 = vpop.eup %1136  ;;  %1086 = vmatmul.mubr.f32.gmra.mxu1 %v574_v9 }
 0x1ca   :  { %v1043_v11 = vpop.f32.mrf.mxu0  ;;  %1088 = vmatprep.mubr.msk.f32.mxu1 %vm1171_vm1, %v1170_v2  ;;  %v811_v12 = vadd.f32 -1.0, %v1137_v10 }
 0x1cb   :  { %v559_v59 = vmul.f32 1.442695, %v528_v8  ;;  %vm543_vm3 = vcmp.gt.f32.partialorder %v528_v8, 0.0 }
 0x1cc   :  { %v532_v13 = vpop.f32.mrf.mxu0  ;;  %v575_v15 = vsel %vm539_vm14, %v508_v46, %v811_v12 }
 0x1cd   :  { %1144 = vpow2.f32 %v559_v59  ;;  %v533_v14 = vadd.f32 %v1573_v32, %v532_v13  ;;  %v1139_v16 = vpop.eup %1138  ;;  %1089 = vmatmul.mubr.f32.gmra.mxu1 %v575_v15 }
 0x1ce   :  { %v1046_v17 = vpop.f32.mrf.mxu0  ;;  %1091 = vmatprep.mubr.msk.f32.mxu1 %vm1171_vm1, %v1170_v2  ;;  %v812_v19 = vadd.f32 -1.0, %v1139_v16 }
 0x1cf   :  { %v561_v18 = vmul.f32 1.442695, %v533_v14  ;;  %vm544_vm4 = vcmp.gt.f32.partialorder %v533_v14, 0.0 }
 0x1d0   :  { %v576_v20 = vsel %vm540_vm15, %v513_v50, %v812_v19 }
 0x1d1   :  { %1146 = vpow2.f32 %v561_v18  ;;  %1092 = vmatmul.mubr.f32.gmra.mxu1 %v576_v20 }
 0x1d2   :  { %v1141_v21 = vpop.eup %1140  ;;  %1094 = vmatprep.mubr.msk.f32.mxu1 %vm1171_vm1, %v1170_v2 }
 0x1d3   :  { %v813_v22 = vadd.f32 -1.0, %v1141_v21 }
 0x1d5   :  { %v577_v23 = vsel %vm541_vm0, %v518_v57, %v813_v22 }
 0x1d6   :  { %v1143_v24 = vpop.eup %1142  ;;  %1095 = vmatmul.mubr.f32.gmra.mxu1 %v577_v23 }
 0x1d7   :  { %1097 = vmatprep.mubr.msk.f32.mxu1 %vm1171_vm1, %v1170_v2  ;;  %v814_v25 = vadd.f32 -1.0, %v1143_v24 }
 0x1d9   :  { %v578_v26 = vsel %vm542_vm2, %v523_v0, %v814_v25 }
 0x1da   :  { %v1145_v27 = vpop.eup %1144  ;;  %1098 = vmatmul.mubr.f32.gmra.mxu1 %v578_v26 }
 0x1db   :  { %1100 = vmatprep.mubr.msk.f32.mxu1 %vm1171_vm1, %v1170_v2  ;;  %v815_v28 = vadd.f32 -1.0, %v1145_v27 }
 0x1dd   :  { %v579_v29 = vsel %vm543_vm3, %v528_v8, %v815_v28 }
 0x1de   :  { %v1147_v30 = vpop.eup %1146  ;;  %1101 = vmatmul.mubr.f32.gmra.mxu1 %v579_v29 }
 0x1df   :  { %1103 = vmatprep.mubr.msk.f32.mxu1 %vm1171_vm1, %v1170_v2  ;;  %v816_v31 = vadd.f32 -1.0, %v1147_v30 }
 0x1e1   :  { %v580_v32 = vsel %vm544_vm4, %v533_v14, %v816_v31 }
 0x1e2   :  { %1104 = vmatmul.mubr.f32.gmra.mxu1 %v580_v32 }
 0x281   :  { %v670_v35 = vpop.f32.mrf.mxu1 }
 0x282   :  { %v671_v36 = vadd.f32 %v817_v34, %v670_v35 }
 0x283   :  { %v1081_v37 = vpop.f32.mrf.mxu1 }
 0x284   :  { %754 = vst.msk [vmem:[#allocation2] sm:$0xff] %vm753_vm5, %v671_v36 }
 0x285   :  { %v675_v38 = vpop.f32.mrf.mxu1 }
 0x286   :  { %v676_v39 = vadd.f32 %v817_v34, %v675_v38 }
 0x287   :  { %v1084_v2 = vpop.f32.mrf.mxu1 }
 0x288   :  { %755 = vst.msk [vmem:[#allocation2 + $0x8] sm:$0xff] %vm753_vm5, %v676_v39 }
 0x289   :  { %v680_v40 = vpop.f32.mrf.mxu1 }
 0x28a   :  { %v681_v41 = vadd.f32 %v817_v34, %v680_v40 }
 0x28b   :  { %v1087_v42 = vpop.f32.mrf.mxu1 }
 0x28c   :  { %756 = vst.msk [vmem:[#allocation2 + $0x10] sm:$0xff] %vm753_vm5, %v681_v41 }
 0x28d   :  { %v685_v43 = vpop.f32.mrf.mxu1 }
 0x28e   :  { %v686_v44 = vadd.f32 %v817_v34, %v685_v43 }
 0x28f   :  { %v1090_v45 = vpop.f32.mrf.mxu1 }
 0x290   :  { %757 = vst.msk [vmem:[#allocation2 + $0x18] sm:$0xff] %vm753_vm5, %v686_v44 }
 0x291   :  { %v690_v46 = vpop.f32.mrf.mxu1 }
 0x292   :  { %v691_v47 = vadd.f32 %v817_v34, %v690_v46 }
 0x293   :  { %v1093_v48 = vpop.f32.mrf.mxu1 }
 0x294   :  { %758 = vst.msk [vmem:[#allocation2 + $0x20] sm:$0xff] %vm753_vm5, %v691_v47 }
 0x296   :  { %v695_v49 = vpop.f32.mrf.mxu1 }
 0x297   :  { %v696_v50 = vadd.f32 %v817_v34, %v695_v49 }
 0x298   :  { %v1096_v51 = vpop.f32.mrf.mxu1 }
 0x299   :  { %759 = vst.msk [vmem:[#allocation2 + $0x28] sm:$0xff] %vm753_vm5, %v696_v50 }
 0x29a   :  { %v700_v52 = vpop.f32.mrf.mxu1 }
 0x29b   :  { %v701_v53 = vadd.f32 %v817_v34, %v700_v52 }
 0x29c   :  { %v1099_v54 = vpop.f32.mrf.mxu1 }
 0x29d   :  { %760 = vst.msk [vmem:[#allocation2 + $0x30] sm:$0xff] %vm753_vm5, %v701_v53 }
 0x29e   :  { %v705_v55 = vpop.f32.mrf.mxu1 }
 0x29f   :  { %v706_v56 = vadd.f32 %v817_v34, %v705_v55 }
 0x2a0   :  { %v1102_v57 = vpop.f32.mrf.mxu1 }
 0x2a1   :  { %761 = vst.msk [vmem:[#allocation2 + $0x38] sm:$0xff] %vm753_vm5, %v706_v56 }
 0x2a2   :  { %v710_v58 = vpop.f32.mrf.mxu1 }
 0x2a3   :  { %1159 = shalt.err (!%p1156_p4)
}
 0x2a4   :  { %s1174_s3 = smov 128   ;;  %s1175_s24 = smov 8   ;;  %v1105_v60 = vpop.f32.mrf.mxu1 }
 0x2a5   :  { %774 = dma.vmem_to_hbm [thread:$0]  %s769_s23, 1152, %s1624_s9, [#allocation3], %s1174_s3, %s1174_s3, %s1175_s24  }
 0x2a6   :  { %1168 = dma.done.wait [#allocation3], 1152  }
 0x2a7   :  { %1169 = vsyncadd [#allocation3], 4294966144 }
 0x2a8   :  { %778 = vsyncpa [#allocation3], 1 }

</bundles_post_ra>
